<compile_context>
chip_gen: v7x
topology: tpu7x:2x2x1
jax: 0.10.0
libtpu: 0.0.40
codegen_flags: <defaults>
</compile_context>

<pallas_src>
import math
import functools

import jax
import jax.numpy as jnp
from jax.experimental import pallas as pl
from jax.experimental.pallas import tpu as pltpu


_LANE = 128
_SUBLANE = 8


def _round_up(x, m):
    return ((x + m - 1) // m) * m


def _tpu_vmem_budget():
    """Generation-aware VMEM sizing.

    Returns (tile_budget_bytes, vmem_limit_bytes, assumed_num_cores).
    v5e/v6e: 128 MiB VMEM, single TensorCore.  v7x: 64 MiB per TC, 2 TCs.
    Falls back to the conservative (v7x-safe) numbers if the query fails.
    """
    try:
        info = pltpu.get_tpu_info()
        vmem = int(getattr(info, "vmem_capacity_bytes", 64 * 1024 * 1024))
    except Exception:
        vmem = 64 * 1024 * 1024
    if vmem >= 100 * 1024 * 1024:                       # v5e / v6e
        return 80 * 1024 * 1024, 96 * 1024 * 1024, 1
    return 36 * 1024 * 1024, 48 * 1024 * 1024, 2        # v7x-safe


def _random_layer_kernel(*refs, num_inputs, scale):
    """refs = (x_0, w_0, x_1, w_1, ..., x_{n-1}, w_{n-1}, out).

    Each grid step sees one (tile_b, tile_n) output tile, the matching batch
    rows of every x_i and one column tile of every R_i. All matmuls (MXU, f32
    accumulation) + scaling + Hadamard product (VPU) are fused in VMEM.
    """
    out_ref = refs[-1]
    in_refs = refs[:-1]

    acc = jnp.dot(in_refs[0][...], in_refs[1][...],
                  preferred_element_type=jnp.float32) * scale
    for i in range(1, num_inputs):
        acc = acc * jnp.dot(in_refs[2 * i][...], in_refs[2 * i + 1][...],
                            preferred_element_type=jnp.float32)

    out_ref[...] = acc.astype(out_ref.dtype)


def _vmem_tile_bytes(tile_b, tile_n, sum_d_pad, itemsize):
    return (2 * sum_d_pad * tile_n * itemsize     # weight tiles (double-buffered)
            + 2 * tile_b * sum_d_pad * itemsize   # x tiles (double-buffered)
            + 2 * tile_b * tile_n * 4             # f32 output tile (double-buffered)
            + 2 * tile_b * tile_n * 4)            # in-kernel f32 acc + dot result


def _choose_tiles(B, n_pad, sum_d_pad, itemsize, budget, num_cores):
    """Pick (tile_b, tile_n).

    tile_n candidates are multiples of 128 that divide n_pad (no extra padded
    columns ever streamed).  On 2-TC parts we keep >= 2 TOTAL grid steps when
    possible, but never shrink tile_n if the batch axis already provides them.
    """
    divisors = [c for c in range(_LANE, n_pad + 1, _LANE) if n_pad % c == 0]
    divisors.sort(reverse=True)

    tile_b = min(256, _round_up(B, _SUBLANE))
    while True:
        b_tiles = _round_up(B, tile_b) // tile_b
        for tile_n in divisors:
            n_tiles = n_pad // tile_n
            if (num_cores >= 2 and b_tiles * n_tiles < 2
                    and n_pad >= 2 * _LANE):
                continue
            if _vmem_tile_bytes(tile_b, tile_n, sum_d_pad, itemsize) <= budget:
                return tile_b, tile_n
        if tile_b <= _SUBLANE:
            return _SUBLANE, _LANE        # last-resort minimum tiles
        tile_b = _round_up(max(_SUBLANE, tile_b // 2), _SUBLANE)


def prepare_random_matrices(random_matrices, *, output_dim,
                            compute_dtype=jnp.bfloat16):
    """Pad/cast the FIXED random matrices once (hoisted out of the forward):
    d_i -> multiple of 8, output_dim -> multiple of 128, dtype -> compute_dtype.
    Padding/cast is skipped when already aligned."""
    n_pad = _round_up(output_dim, _LANE)
    prepped = []
    for w in random_matrices:
        d, n = w.shape
        assert n == output_dim
        d_pad = _round_up(d, _SUBLANE)
        if w.dtype != compute_dtype:
            w = w.astype(compute_dtype)
        if (d_pad, n_pad) != (d, n):
            w = jnp.pad(w, ((0, d_pad - d), (0, n_pad - n)))
        prepped.append(w)
    return prepped


def random_layer_forward(input_list, random_matrices, *, output_dim,
                         compute_dtype=jnp.bfloat16, prepped=False,
                         tile_n=None):
    """Pallas implementation of RandomLayer.forward.

    input_list:       list of [B, d_i] float arrays
    random_matrices:  list of [d_i, output_dim] arrays, or (prepped=True) the
                      output of prepare_random_matrices()
    compute_dtype:    MXU operand dtype (bfloat16 default; jnp.float32 gives
                      bit-closer parity with the torch module)
    returns:          [B, output_dim] float32
    """
    num_inputs = len(input_list)
    assert num_inputs == len(random_matrices) and num_inputs >= 1
    B = input_list[0].shape[0]
    N = output_dim
    dims = [int(x.shape[1]) for x in input_list]
    for x, d in zip(input_list, dims):
        assert x.shape == (B, d)

    if prepped:
        weights = list(random_matrices)
        compute_dtype = weights[0].dtype
    else:
        weights = prepare_random_matrices(random_matrices, output_dim=N,
                                          compute_dtype=compute_dtype)
    itemsize = jnp.dtype(compute_dtype).itemsize

    n_pad = int(weights[0].shape[1])
    d_pads = [int(w.shape[0]) for w in weights]
    sum_d_pad = sum(d_pads)
    assert n_pad == _round_up(N, _LANE)
    for d, d_pad, w in zip(dims, d_pads, weights):
        assert d_pad == _round_up(d, _SUBLANE) and w.shape == (d_pad, n_pad)

    scale = 1.0 / math.pow(float(N), 1.0 / num_inputs)

    budget, vmem_limit, num_cores = _tpu_vmem_budget()
    tile_b, auto_tile_n = _choose_tiles(B, n_pad, sum_d_pad, itemsize,
                                        budget, num_cores)
    if tile_n is None:
        tile_n = auto_tile_n
    assert tile_n % _LANE == 0 and n_pad % tile_n == 0

    b_pad = _round_up(B, tile_b)
    b_tiles = b_pad // tile_b
    n_tiles = n_pad // tile_n

    operands = []
    in_specs = []
    for x, w, d, d_pad in zip(input_list, weights, dims, d_pads):
        if x.dtype != compute_dtype:
            x = x.astype(compute_dtype)
        if (b_pad, d_pad) != (B, d):
            x = jnp.pad(x, ((0, b_pad - B), (0, d_pad - d)))
        operands.append(x)
        # x_i: one batch-row tile, full (padded) reduction dim.  Batch is the
        # INNER grid axis, so only these small tiles get re-fetched.
        in_specs.append(pl.BlockSpec((tile_b, d_pad), lambda j, i: (i, 0)))
        operands.append(w)
        # R_i: one column tile, constant along the inner (batch) axis ->
        # each weight tile is streamed from HBM exactly once.
        in_specs.append(pl.BlockSpec((d_pad, tile_n), lambda j, i: (0, j)))

    out_spec = pl.BlockSpec((tile_b, tile_n), lambda j, i: (i, j))

    kernel = functools.partial(
        _random_layer_kernel, num_inputs=num_inputs, scale=scale
    )

    # Advisory cost hint (matches the actual HBM traffic of this grid order).
    cost = pl.CostEstimate(
        flops=2 * B * sum(dims) * N + num_inputs * B * N,
        transcendentals=0,
        bytes_accessed=(sum(dp * n_pad for dp in d_pads) * itemsize   # W once
                        + n_tiles * b_pad * sum_d_pad * itemsize      # x per col tile
                        + b_pad * n_pad * 4),                         # f32 output
    )

    out = pl.pallas_call(
        kernel,
        out_shape=jax.ShapeDtypeStruct((b_pad, n_pad), jnp.float32),
        grid_spec=pltpu.PrefetchScalarGridSpec(
            num_scalar_prefetch=0,
            grid=(n_tiles, b_tiles),        # batch innermost -> weights resident
            in_specs=in_specs,
            out_specs=out_spec,
        ),
        compiler_params=pltpu.CompilerParams(
            dimension_semantics=("parallel", "parallel"),
            vmem_limit_bytes=vmem_limit,
        ),
        cost_estimate=cost,
    )(*operands)

    return out[:B, :N]


def random_layer_reference(input_list, random_matrices, output_dim,
                           cast_dtype=None):
    """Pure-JAX reference mirroring the PyTorch forward.

    cast_dtype=None     -> full f32 math (matches the torch module exactly)
    cast_dtype=bfloat16 -> same operand cast the kernel wrapper performs
                           (f32 accumulation), for a tight kernel check.
    """
    def _cast(a):
        return a if cast_dtype is None else a.astype(cast_dtype)

    projs = [jnp.dot(_cast(x), _cast(w), preferred_element_type=jnp.float32)
             for x, w in zip(input_list, random_matrices)]
    out = projs[0] / math.pow(float(output_dim), 1.0 / len(projs))
    for p in projs[1:]:
        out = out * p
    return out


if __name__ == "__main__":
    key = jax.random.PRNGKey(0)

    # Small shapes consistent with RandomLayer: two inputs (e.g. feature +
    # softmax branches of a domain discriminator).
    B = 8
    input_dim_list = [32, 16]
    output_dim = 256

    keys = jax.random.split(key, 2 * len(input_dim_list))
    input_list = [
        jax.random.normal(keys[2 * i], (B, d), dtype=jnp.float32)
        for i, d in enumerate(input_dim_list)
    ]
    # Deterministic stand-in for torch.randn(input_dim_list[i], output_dim).
    random_matrices = [
        jax.random.normal(keys[2 * i + 1], (d, output_dim), dtype=jnp.float32)
        for i, d in enumerate(input_dim_list)
    ]

    # Hoist the weight pad + bf16 cast out of the per-call path (fixed buffers,
    # prepared once at "layer init").
    prepped_w = prepare_random_matrices(random_matrices, output_dim=output_dim)

    out = random_layer_forward(
        input_list, prepped_w, output_dim=output_dim, prepped=True
    )
    out = jax.block_until_ready(out)
    assert out.shape == (B, output_dim)

    # Tight check: same bf16 operand cast as the kernel, f32 accumulation.
    ref_bf16 = random_layer_reference(
        input_list, random_matrices, output_dim, cast_dtype=jnp.bfloat16
    )
    assert jnp.allclose(out, ref_bf16, rtol=1e-3, atol=1e-3), \
        "mismatch vs bf16-domain reference"

    # Loose sanity check vs the full-f32 PyTorch-equivalent math.
    ref_f32 = random_layer_reference(input_list, random_matrices, output_dim)
    assert jnp.allclose(out, ref_f32, rtol=5e-2, atol=2e-1), \
        "mismatch vs f32 reference"

    print("KERNEL_OK")
</pallas_src>

<mosaic_0001>
module attributes {stable_mosaic.version = 11 : i64} {
  func.func @_random_layer_kernel(%arg0: i32, %arg1: i32, %arg2: memref<8x32xbf16, #tpu.memory_space<vmem>>, %arg3: memref<32x128xbf16, #tpu.memory_space<vmem>>, %arg4: memref<8x16xbf16, #tpu.memory_space<vmem>>, %arg5: memref<16x128xbf16, #tpu.memory_space<vmem>>, %arg6: memref<8x128xf32, #tpu.memory_space<vmem>>) attributes {dimension_semantics = [#tpu.dimension_semantics<parallel>, #tpu.dimension_semantics<parallel>], iteration_bounds = array<i64: 2, 1>, scalar_prefetch = 0 : i64, scratch_operands = 0 : i64, tpu.core_type = #tpu.core_type<tc>, window_params = [{transform_indices = @transform_0, window_bounds = array<i64: 8, 32>}, {transform_indices = @transform_1, window_bounds = array<i64: 32, 128>}, {transform_indices = @transform_2, window_bounds = array<i64: 8, 16>}, {transform_indices = @transform_3, window_bounds = array<i64: 16, 128>}, {transform_indices = @transform_4, window_bounds = array<i64: 8, 128>}]} {
    %c0 = arith.constant 0 : index
    %c0_0 = arith.constant 0 : index
    %0 = vector.load %arg2[%c0, %c0_0] : memref<8x32xbf16, #tpu.memory_space<vmem>>, vector<8x32xbf16>
    %c0_1 = arith.constant 0 : index
    %c0_2 = arith.constant 0 : index
    %1 = vector.load %arg3[%c0_1, %c0_2] : memref<32x128xbf16, #tpu.memory_space<vmem>>, vector<32x128xbf16>
    %cst = arith.constant dense<0.000000e+00> : vector<8x128xf32>
    %2 = tpu.matmul %0, %1, %cst {dimension_numbers = #tpu.dot_dimension_numbers<[1], [0], [0], [1], [0, 0, 1, 1], [], []>} : vector<8x32xbf16>, vector<32x128xbf16>, vector<8x128xf32> -> vector<8x128xf32>
    %cst_3 = arith.constant 6.250000e-02 : f32
    %3 = vector.broadcast %cst_3 : f32 to vector<8x128xf32>
    %4 = arith.mulf %2, %3 : vector<8x128xf32>
    %c0_4 = arith.constant 0 : index
    %c0_5 = arith.constant 0 : index
    %5 = vector.load %arg4[%c0_4, %c0_5] : memref<8x16xbf16, #tpu.memory_space<vmem>>, vector<8x16xbf16>
    %c0_6 = arith.constant 0 : index
    %c0_7 = arith.constant 0 : index
    %6 = vector.load %arg5[%c0_6, %c0_7] : memref<16x128xbf16, #tpu.memory_space<vmem>>, vector<16x128xbf16>
    %cst_8 = arith.constant dense<0.000000e+00> : vector<8x128xf32>
    %7 = tpu.matmul %5, %6, %cst_8 {dimension_numbers = #tpu.dot_dimension_numbers<[1], [0], [0], [1], [0, 0, 1, 1], [], []>} : vector<8x16xbf16>, vector<16x128xbf16>, vector<8x128xf32> -> vector<8x128xf32>
    %8 = arith.mulf %4, %7 : vector<8x128xf32>
    %c0_9 = arith.constant 0 : index
    %c0_10 = arith.constant 0 : index
    %9 = vector.load %arg6[%c0_9, %c0_10] : memref<8x128xf32, #tpu.memory_space<vmem>>, vector<8x128xf32>
    tpu.vector_store %arg6[%c0_9, %c0_10], %8 {strides = array<i32>} : memref<8x128xf32, #tpu.memory_space<vmem>>, vector<8x128xf32>,
    return
  }
  func.func @transform_0(%arg0: i32, %arg1: i32) -> (i32, i32) {
    %c0_i32 = arith.constant 0 : i32
    %c0_i32_0 = arith.constant 0 : i32
    return %arg1, %c0_i32 : i32, i32
  }
  func.func @transform_1(%arg0: i32, %arg1: i32) -> (i32, i32) {
    %c0_i32 = arith.constant 0 : i32
    %c0_i32_0 = arith.constant 0 : i32
    return %c0_i32, %arg0 : i32, i32
  }
  func.func @transform_2(%arg0: i32, %arg1: i32) -> (i32, i32) {
    %c0_i32 = arith.constant 0 : i32
    %c0_i32_0 = arith.constant 0 : i32
    return %arg1, %c0_i32 : i32, i32
  }
  func.func @transform_3(%arg0: i32, %arg1: i32) -> (i32, i32) {
    %c0_i32 = arith.constant 0 : i32
    %c0_i32_0 = arith.constant 0 : i32
    return %c0_i32, %arg0 : i32, i32
  }
  func.func @transform_4(%arg0: i32, %arg1: i32) -> (i32, i32) {
    %c0_i32 = arith.constant 0 : i32
    return %arg1, %arg0 : i32, i32
  }
}

</mosaic_0001>

<bundles_post_ra>
// kernel: tpu_custom_call.1
= control target key start
LH: loop header
LB: loop body
LE: loop exit
PB: predicated region body
PF: predicated region fallthrough
CT: control target
= control target key end

     0   :  { %9 = vsyncpa [#allocation3], 0  ;;  %s1171_s0 = inlined_call_operand.hbm [shape: bf16[8,32], index: 0, kind: input, shape index: {}]   ;;  %s1172_s1 = inlined_call_operand.hbm [shape: bf16[32,256], index: 1, kind: input, shape index: {}]   ;;  %s1173_s2 = inlined_call_operand.vmem [shape: bf16[8,16], index: 2, kind: input, shape index: {}]   ;;  %s1174_s3 = inlined_call_operand.hbm [shape: bf16[16,256], index: 3, kind: input, shape index: {}]   ;;  %s1175_s4 = inlined_call_operand.hbm [shape: f32[8,256], index: 4, kind: output, shape index: {}]  }
   0x1   :  { %10 = vsyncpa [#allocation6], 0 }
   0x2   :  { %12 = vsyncpa [#allocation6 + $0x1], 0 }
   0x3   :  { %13 = vsyncpa [#allocation4], 0 }
   0x4   :  { %15 = vsyncpa [#allocation4 + $0x1], 0  ;;  %s904_s15 = smov 0   ;;  %s906_s16 = smov 0  }
   0x5   :  { %s908_s17 = smov 0   ;;  %s910_s18 = smov 0  }
   0x6   :  { %s912_s19 = smov 0   ;;  %s914_s20 = smov 0  }
   0x7 LB: > { %s33_s21 = sadd.s32 1, %s864_s19  ;;  %s66_s22 = sadd.s32 1, %s856_s17  ;;  %s868_s20 = sphi %s914_s20, %s21_s20   ;;  %s864_s19 = sphi %s912_s19, %s1203_s19   ;;  %s860_s18 = sphi %s910_s18, %s1202_s18   ;;  %s856_s17 = sphi %s908_s17, %s1201_s17   ;;  %s852_s16 = sphi %s906_s16, %s1200_s16   ;;  %s848_s15 = sphi %s904_s15, %s1199_s15  }
   0x8   : > { %p35_p0 = scmp.ge.s32.totalorder %s33_s21, 2  ;;  %p73_p1 = scmp.ne.s32.totalorder %s856_s17, %s852_s16 }
   0x9   : > { %p74_p2 = scmp.eq.s32.totalorder %s868_s20, 0  ;;  %p634_p5 = scmp.lt.s32.totalorder %s868_s20, 2 }
   0xa   : > { %s1205_s21 = smov (%p35_p0, %s33_s21), 0  ;;  %s203_s24 = sand.u32 1, %s868_s20  }
   0xb   : > { %p75_p4 = por %p74_p2, %p73_p1  ;;  %s63_s23 = ssub.s32 %s864_s19, %s1205_s21 }
   0xc   : > { %p64_p6 = scmp.eq.s32.totalorder %s63_s23, 0  ;;  %s205_s25 = sand.u32 1, %s856_s17  }
   0xd   : > { %s572_s26 = sshll.u32 %s864_s19, 6  ;;  %s571_s28 = sshll.u32 %s205_s25, 4 }
   0xe   : > { %s952_s27 = scalar_select %p64_p6, %s856_s17, %s66_s22  }
   0xf   : > { %s961_s5 = scalar_lea.hbm %s1172_s1, %s572_s26  ;;  %p963_p7 = pnand %p634_p5, %p75_p4 }
  0x10   : > { %s207_s7 = scalar_lea.vmem [#allocation5], %s571_s28  ;;  %s969_s9 = scalar_lea.sflag [#allocation6], %s203_s24 }
  0x11   : > { %s213_s8 = sshll.u32 %s207_s7, 4  ;;  %s694_s10 = scalar_lea.hbm %s961_s5, 256  ;;  %s967_s8 = int_to_ptr.vmem [resolvable:$true] %s213_s8 }
  0x12   : > { %p695_p8 = scmp.ne.s32.totalorder %s961_s5, %s694_s10  ;;  %p696_p9 = pneg %p963_p7 }
  0x13   : > { %s699_s13 = scalar_lea.hbm %s1172_s1, 512  ;;  %p700_p12 = scmp.lt.u32.totalorder %s961_s5, %s1172_s1 }
  0x14   : > { %p697_p10 = pnand %p696_p9, %p695_p8  ;;  %p701_p13 = scmp.lt.u32.totalorder %s699_s13, %s694_s10 }
  0x15   : > { %p703_p2 = scmp.lt.u32.totalorder %s694_s10, %s961_s5 }
  0x16   : > { %p698_p11 = pneg %p697_p10  ;;  %p702_p0 = por %p701_p13, %p700_p12 }
  0x18   : > { %p704_p4 = por %p703_p2, %p702_p0 }
  0x1a   : > { %p705_p5 = pnand %p704_p4, %p698_p11 }
  0x1c   : > { %708 = shalt.err (!%p705_p5)
}
  0x1d   : > { %s709_s23 = scalar_lea.vmem %s967_s8, 256  ;;  %s870_s24 = smov [#allocation5]  }
  0x1e   : > { %p710_p6 = scmp.ne.s32.totalorder %s967_s8, %s709_s23  ;;  %s714_s28 = sshll.u32 %s870_s24, 4  ;;  %s715_s28 = int_to_ptr.vmem [resolvable:$false] %s714_s28 }
  0x1f   : > { %s716_s29 = scalar_lea.vmem %s715_s28, 512  ;;  %p717_p3 = scmp.lt.s32.totalorder %s967_s8, %s715_s28 }
  0x20   : > { %p712_p8 = pnand %p710_p6, %p696_p9  ;;  %p718_p12 = scmp.lt.s32.totalorder %s716_s29, %s709_s23 }
  0x22   : > { %p713_p10 = pneg %p712_p8  ;;  %p719_p13 = por %p718_p12, %p717_p3 }
  0x24   : > { %p720_p0 = pnand %p719_p13, %p713_p10 }
  0x26   : > { %723 = shalt.err (!%p720_p0)
}
  0x27   : > { %s1176_s30 = smov 128   ;;  %s1177_s7 = smov 64  }
  0x28   : > { %s873_s10 = smov 4   ;;  %s573_s11 = sshll.u32 %s205_s25, 3 }
  0x29   : > { %625 = dma.hbm_to_vmem [thread:$0]  (!%p963_p7), %s961_s5, 256, %s967_s8, %s969_s9, %s1176_s30, %s1177_s7, %s873_s10  }
  0x2a   : > { %s1007_s14 = scalar_lea.hbm %s1174_s3, %s572_s26  ;;  %s227_s22 = scalar_lea.vmem [#allocation7], %s573_s11 }
  0x2b   : > { %s233_s23 = sshll.u32 %s227_s22, 4  ;;  %s1010_s24 = sadd.s32 4294967295, %s868_s20   ;;  %s1036_s23 = int_to_ptr.vmem [resolvable:$true] %s233_s23 }
  0x2c   : > { %s566_s28 = sadd.s32 4294967294, %s868_s20   ;;  %p79_p3 = scmp.ne.s32.totalorder %s852_s16, %s848_s15 }
  0x2d   : > { %p1178_p11 = scmp.eq.s32.totalorder %s1010_s24, 0  ;;  %p157_p2 = scmp.eq.s32.totalorder %s1010_s24, 1 }
  0x2e   : > { %p163_p4 = scmp.eq.s32.totalorder %s566_s28, 1  ;;  %p567_p5 = scmp.ge.s32.totalorder %s868_s20, 1 }
  0x2f   : > { %p1020_p6 = por %p1178_p11, %p79_p3  ;;  %p1027_p8 = por %p157_p2, %p73_p1 }
  0x30   : > { %p1031_p10 = por %p163_p4, %p79_p3  ;;  %p170_p12 = scmp.lt.s32.totalorder %s868_s20, 3 }
  0x31   : > { %s1183_s25 = scalar_select %p1020_p6, 1, 0 }
  0x32   : > { %s1184_s26 = scalar_select %p1027_p8, 1, 0 }
  0x33   : > { %s1185_s5 = scalar_select %p1031_p10, 1, 0 }
  0x34   : > { %p1038_p13 = pnand %p567_p5, %p170_p12  ;;  %s874_s29 = smov [#allocation2]  }
  0x35   : > { %s1042_s11 = sshll.u32 %s874_s29, 4  ;;  %s724_s12 = scalar_lea.hbm %s1007_s14, 128  ;;  %s186_s11 = int_to_ptr.vmem [resolvable:$true] %s1042_s11 }
  0x36   : > { %s1186_s8 = scalar_select %p1038_p13, 1, 0 }
  0x37   : > { %p725_p0 = scmp.ne.s32.totalorder %s1007_s14, %s724_s12  ;;  %s729_s28 = scalar_lea.hbm %s1174_s3, 256 }
  0x38   : > { %p730_p4 = scmp.lt.u32.totalorder %s1007_s14, %s1174_s3  ;;  %p731_p5 = scmp.lt.u32.totalorder %s729_s28, %s724_s12 }
  0x39   : > { %p727_p3 = pnand %p725_p0, %p696_p9  ;;  %p733_p11 = scmp.lt.u32.totalorder %s724_s12, %s1007_s14 }
  0x3a   : > { %p732_p12 = por %p731_p5, %p730_p4 }
  0x3b   : > { %p728_p2 = pneg %p727_p3 }
  0x3c   : > { %p734_p10 = por %p733_p11, %p732_p12 }
  0x3e   : > { %p735_p8 = pnand %p734_p10, %p728_p2 }
  0x40   : > { %738 = shalt.err (!%p735_p8)
}
  0x41   : > { %s739_s29 = scalar_lea.vmem %s1036_s23, 128  ;;  %s875_s13 = smov [#allocation7]  }
  0x42   : > { %p740_p0 = scmp.ne.s32.totalorder %s1036_s23, %s739_s29  ;;  %s744_s22 = sshll.u32 %s875_s13, 4  ;;  %s745_s22 = int_to_ptr.vmem [resolvable:$false] %s744_s22 }
  0x43   : > { %s746_s30 = scalar_lea.vmem %s745_s22, 256  ;;  %p747_p6 = scmp.lt.s32.totalorder %s1036_s23, %s745_s22 }
  0x44   : > { %p742_p3 = pnand %p740_p0, %p696_p9  ;;  %p748_p4 = scmp.lt.s32.totalorder %s746_s30, %s739_s29 }
  0x46   : > { %p743_p1 = pneg %p742_p3  ;;  %p749_p5 = por %p748_p4, %p747_p6 }
  0x48   : > { %p750_p11 = pnand %p749_p5, %p743_p1 }
  0x4a   : > { %753 = shalt.err (!%p750_p11)
}
  0x4b   : > { %s1187_s7 = smov 64   ;;  %s1188_s12 = smov 128  }
  0x4c   : > { %628 = dma.hbm_to_vmem [thread:$0]  (!%p963_p7), %s1007_s14, 128, %s1036_s23, %s969_s9, %s1188_s12, %s1187_s7, %s873_s10  }
  0x4d   : > { %p1189_p9 = scmp.eq.s32.totalorder %s1010_s24, 0  ;;  %p1190_p8 = pneg %p1038_p13 }
  0x4e   : > { %s754_s13 = scalar_lea.hbm %s1171_s0, 64 }
  0x4f   : > { %p1079_p10 = pnand %p1190_p8, %p1189_p9  ;;  %p755_p6 = scmp.ne.s32.totalorder %s1171_s0, %s754_s13 }
  0x50   : > { %p761_p12 = scmp.lt.u32.totalorder %s754_s13, %s1171_s0 }
  0x51   : > { %p756_p1 = pneg %p1079_p10 }
  0x53   : > { %p757_p7 = pnand %p756_p1, %p755_p6 }
  0x55   : > { %p758_p2 = pneg %p757_p7 }
  0x57   : > { %p763_p0 = pnand %p761_p12, %p758_p2 }
  0x59   : > { %766 = shalt.err (!%p763_p0)
}
  0x5a   : > { %s767_s14 = scalar_lea.vmem %s186_s11, 64  ;;  %p775_p11 = scmp.lt.s32.totalorder %s186_s11, %s186_s11 }
  0x5b   : > { %p768_p3 = scmp.ne.s32.totalorder %s186_s11, %s767_s14  ;;  %p776_p9 = scmp.lt.s32.totalorder %s767_s14, %s767_s14 }
  0x5d   : > { %p770_p4 = pnand %p768_p3, %p756_p1  ;;  %p777_p8 = por %p776_p9, %p775_p11 }
  0x5f   : > { %p771_p5 = pneg %p770_p4 }
  0x61   : > { %p778_p13 = pnand %p777_p8, %p771_p5 }
  0x63   : > { %781 = shalt.err (!%p778_p13)
}
  0x64   : > { %621 = dma.hbm_to_vmem [thread:$0]  (!%p1079_p10), %s1171_s0, 64, %s186_s11, [#allocation3]  }
  0x65   : > { %p1192_p6 = scmp.ne.s32.totalorder %s1186_s8, 0 }
  0x66   : > { %p1193_p7 = scmp.eq.s32.totalorder (!%p1192_p6), %s1010_s24, 0 }
  0x67   : > { %245 = sbr.rel (%p1192_p6) target bundleno = 356 (0x164), region = 36 }
  0x6e   : > { %835 = dma.done.wait (%p1193_p7), [#allocation3], 64   ;;  %p1194_p1 = pmov %p1193_p7 }
  0x6f   : > { %s251_s12 = sand.u32 1, %s1010_s24   ;;  %s1107_s29 = sand.u32 1, %s852_s16  }
  0x70   : > { %837 = vsyncadd (%p1194_p1), [#allocation3], 4294967232  ;;  %s577_s28 = sshll.u32 %s1107_s29, 4  ;;  %s252_s6 = scalar_lea.sflag [#allocation6], %s251_s12 }
  0x71   : > { %s255_s13 = scalar_lea.vmem [#allocation5], %s577_s28  ;;  %p1195_p13 = scmp.ne.s32.totalorder %s1183_s25, 0 }
  0x73   : > { %839 = dma.done.wait (%p1195_p13), %s252_s6, 384  }
  0x74   : > { %841 = vsyncadd (%p1195_p13), %s252_s6, 4294966912  ;;  %v876_v0 = vmov 0.0   ;;  %s578_s8 = sshll.u32 %s1107_s29, 3  ;;  %vm877_vm0 = vmmov 0   ;;  %v691_v1 = vld [vmem:[%s255_s13] sm:$0xff]   ;;  %v693_v3 = vld [vmem:[%s255_s13 + $0x8] sm:$0xff]  }
  0x75   : > { %594 = vmatprep.subr.bf16.mxu0 %v876_v0  ;;  %602 = vmatprep.subr.bf16.mxu1 %v876_v0  ;;  %s264_s24 = scalar_lea.vmem [#allocation7], %s578_s8  ;;  %v365_v4 = vld [vmem:[%s1173_s2] sm:$0xf]  ;;  %vm374_vm1 = vcmask 130048   ;;  %vm320_vm2 = vcmask 261120   ;;  %s586_s25 = sshll.u32 %s860_s18, 7 }
  0x76   : > { %604 = vmatprep.mubr.msk.bf16.mxu1 %vm877_vm0, %v876_v0  ;;  %598 = vmatprep.mubr.msk.bf16.mxu0 %vm877_vm0, %v876_v0  ;;  %v692_v2 = vld [vmem:[%s264_s24] sm:$0xff]   ;;  %v303_v5 = vld [vmem:[#allocation2] sm:$0xf]  ;;  %s297_s30 = scalar_lea.vmem [#allocation8], %s578_s8  ;;  %s1122_s23 = scalar_lea.hbm %s1175_s4, %s586_s25 }
  0x77   : > { %595 = vmatpush3.bf16.msra.mxu0 %v691_v1  ;;  %603 = vmatpush3.bf16.msra.mxu1 %v692_v2  ;;  %s436_s9 = sshll.u32 %s297_s30, 4  ;;  %s421_s7 = scalar_lea.sflag [#allocation4], %s1107_s29  ;;  %s1124_s9 = int_to_ptr.vmem [resolvable:$true] %s436_s9 }
  0x78   : > { %596 = vmatprep.subr.bf16.mxu0 %v876_v0  ;;  %s782_s18 = scalar_lea.vmem %s1124_s9, 128  ;;  %p1196_p2 = scmp.ne.s32.totalorder %s1184_s26, 0 }
  0x79   : > { %p783_p10 = scmp.ne.s32.totalorder %s1124_s9, %s782_s18  ;;  %s878_s12 = smov [#allocation8]  }
  0x7a   : > { %605 = vmatmul.mubr.msk.bf16.vlgmr.msra.gmra.mrb[0].mxu1 %vm374_vm1, %v365_v4  ;;  %s786_s28 = sshll.u32 %s878_s12, 4  ;;  %s787_s28 = int_to_ptr.vmem [resolvable:$false] %s786_s28 }
  0x7b   : > { %597 = vmatpush3.bf16.msra.mxu0 %v693_v3  ;;  %p784_p12 = pnand %p783_p10, %p1196_p2  ;;  %s788_s6 = scalar_lea.vmem %s787_s28, 256 }
  0x7c   : > { %p789_p3 = scmp.lt.s32.totalorder %s1124_s9, %s787_s28  ;;  %p790_p4 = scmp.lt.s32.totalorder %s788_s6, %s782_s18 }
  0x7d   : > { %p785_p0 = pneg %p784_p12 }
  0x7e   : > { %599 = vmatmul.mubr.msk.bf16.vlgmr.msra.gmra.mrb[0].mxu0 %vm320_vm2, %v303_v5  ;;  %p791_p5 = por %p790_p4, %p789_p3 }
  0x80   : > { %p792_p11 = pnand %p791_p5, %p785_p0 }
 0x14d   : > { %v412_v6 = vpop.f32.mrb[0].mxu1 }
 0x14e   : > { %v606_v7 = vpop.f32.mrb[1].mxu1 }
 0x14f   : > { %v415_v8 = vpop.f32.mrb[2].mxu1 }
 0x150   : > { %v607_v10 = vpop.f32.mrb[3].mxu1 }
 0x151   : > { %v358_v9 = vpop.f32.mrb[0].mxu0 }
 0x152   : > { %v364_v11 = vmul.f32 0.0625, %v358_v9  ;;  %v600_v12 = vpop.f32.mrb[1].mxu0 }
 0x153   : > { %v361_v13 = vpop.f32.mrb[2].mxu0 }
 0x154   : > { %v418_v14 = vmul.f32 %v412_v6, %v364_v11  ;;  %v601_v15 = vpop.f32.mrb[3].mxu0 }
 0x156   : > { %419 = vst [vmem:[%s297_s30] sm:$0xff] %v418_v14 }
 0x157   : > { %795 = shalt.err (!%p792_p11)
}
 0x158   : > { %s796_s29 = scalar_lea.hbm %s1122_s23, 128  ;;  %s800_s24 = scalar_lea.hbm %s1175_s4, 256 }
 0x159   : > { %p797_p9 = scmp.ne.s32.totalorder %s1122_s23, %s796_s29  ;;  %p801_p7 = scmp.lt.u32.totalorder %s1122_s23, %s1175_s4 }
 0x15a   : > { %p802_p1 = scmp.lt.u32.totalorder %s800_s24, %s796_s29  ;;  %p804_p10 = scmp.lt.u32.totalorder %s796_s29, %s1122_s23 }
 0x15b   : > { %p798_p8 = pnand %p797_p9, %p1196_p2 }
 0x15c   : > { %p803_p13 = por %p802_p1, %p801_p7 }
 0x15d   : > { %p799_p6 = pneg %p798_p8 }
 0x15e   : > { %p805_p12 = por %p804_p10, %p803_p13 }
 0x160   : > { %p806_p0 = pnand %p805_p12, %p799_p6 }
 0x162   : > { %809 = shalt.err (!%p806_p0)
}
 0x163   : > { %616 = dma.vmem_to_hbm [thread:$0]  (%p1196_p2), %s1124_s9, 128, %s1122_s23, %s421_s7  }
 0x164 PF: > { %s448_s25 = sand.u32 1, %s848_s15   ;;  %p1197_p3 = scmp.ne.s32.totalorder %s1185_s5, 0 }
 0x165   : > { %p1198_p4 = scmp.ge.s32.totalorder %s868_s20, 2  ;;  %s449_s30 = scalar_lea.sflag [#allocation4], %s448_s25 }
 0x167   : > { %p630_p5 = pnand %p1198_p4, %p1197_p3 }
 0x169   : > { %843 = dma.done.wait (!%p630_p5), %s449_s30, 128  }
 0x16a   : > { %845 = vsyncadd (!%p630_p5), %s449_s30, 4294967168  ;;  %s21_s20 = sadd.s32 1, %s868_s20   ;;  %s1199_s15 = smov %s852_s16 }
 0x16b   : > { %p18_p11 = scmp.ge.s32.totalorder %s21_s20, 4   ;;  %s1200_s16 = smov %s856_s17 }
 0x16c   : > { %s1201_s17 = smov %s952_s27  ;;  %s1202_s18 = smov %s864_s19 }
 0x16d   : > { %s1203_s19 = smov %s1205_s21  ;;  %20 = sbr.rel (!%p18_p11) target bundleno = 7 (0x7), region = 101 }
 0x174   :  { %454 = vsyncpa [#allocation3], 1 }
 0x175   :  { %456 = vsyncpa [#allocation3 + $0x1], 1 }
 0x176   :  { %457 = vsyncpa [#allocation6], 1 }
 0x177   :  { %459 = vsyncpa [#allocation6 + $0x1], 1 }
 0x178   :  { %460 = vsyncpa [#allocation4], 1 }
 0x179   :  { %462 = vsyncpa [#allocation4 + $0x1], 1 }

</bundles_post_ra>
